<compile_context>
chip_gen: v6e
topology: v6e:2x2x1
jax: 0.10.0
libtpu: 0.0.40
codegen_flags: <defaults>
</compile_context>

<pallas_src>
import jax
import jax.numpy as jnp
from jax.experimental import pallas as pl
from jax.experimental.pallas import tpu as pltpu

INPUT_SIZE = 4    # ['alcohol', 'sulphates', 'total sulfur dioxide', 'volatile acidity']
OUTPUT_SIZE = 1   # ['quality']

LANE = 128        # f32 lane width
TB_CAP = 65536    # max lanes per grid tile (~2 MiB input block, 2x-buffered ~4 MiB)


def _linear_relu_kernel(w_ref, b_ref, xp_ref, o_ref):
    # w_ref : SMEM (INPUT_SIZE,)  f32  -- weights as scalars
    # b_ref : SMEM (OUTPUT_SIZE,) f32  -- bias as scalar
    # xp_ref: VMEM (2*INPUT_SIZE, TB) f32
    #         sublanes 0..3 = features of batch group A, 4..7 = group B,
    #         lanes = batch index within the group.
    # o_ref : VMEM (2, TB) f32  -- row 0 = group A result, row 1 = group B.
    x = xp_ref[...]                                            # (8, TB)
    acc_a = x[0:1, :] * w_ref[0]                               # unrolled VPU FMAs
    acc_b = x[INPUT_SIZE:INPUT_SIZE + 1, :] * w_ref[0]
    for i in range(1, INPUT_SIZE):
        acc_a = acc_a + x[i:i + 1, :] * w_ref[i]
        acc_b = acc_b + x[INPUT_SIZE + i:INPUT_SIZE + i + 1, :] * w_ref[i]
    bias = b_ref[0]
    o_ref[0:1, :] = jnp.maximum(acc_a + bias, 0.0)
    o_ref[1:2, :] = jnp.maximum(acc_b + bias, 0.0)


def _round_up(n, m):
    return ((n + m - 1) // m) * m


def neural_network_forward(x, w, b):
    """x: (B, ...) f32 flattening to (B, INPUT_SIZE); w: (IN, OUT) f32; b: (OUT,) f32.

    Returns (B, OUTPUT_SIZE) f32 = relu(x @ w + b).
    """
    B = x.shape[0]
    assert B >= 1, "empty batch not supported"
    # nn.Flatten() on an already-2D input is a no-op; keep flatten for generality.
    x2d = x.reshape(B, -1)
    assert x2d.shape[1] == INPUT_SIZE, (
        f"flattened feature width {x2d.shape[1]} != INPUT_SIZE={INPUT_SIZE}")
    # Kernel hard-codes OUTPUT_SIZE == 1 (single bias scalar, single weight row).
    assert OUTPUT_SIZE == 1 and w.shape == (INPUT_SIZE, OUTPUT_SIZE)
    assert b.shape == (OUTPUT_SIZE,)

    # ---- choose lane tile (TB) and padded batch ---------------------------
    # half = per-group batch length; B_pad = 2 * half (two sublane-packed groups).
    half0 = _round_up(pl.cdiv(B, 2), LANE)
    if half0 <= LANE:
        tb = LANE
        half = LANE                      # single 128-lane tile; grid=(1,)
    else:
        # >= 2 tiles so v7x's two TensorCores can shard the parallel batch axis,
        # each tile capped at TB_CAP lanes to bound VMEM while amortizing the
        # ~600-cycle per-grid-step overhead.
        n_tiles = max(2, pl.cdiv(half0, TB_CAP))
        tb = _round_up(pl.cdiv(half0, n_tiles), LANE)
        half = _round_up(half0, tb)
    B_pad = 2 * half
    grid_n = half // tb

    # ---- single layout pass: pad + pack two batch halves into 8 sublanes --
    # (B,4) -> (B_pad,4) -> (2, half, 4) -> (2, 4, half) -> (8, half)
    xpad = jnp.pad(x2d, ((0, B_pad - B), (0, 0)))
    xp = xpad.reshape(2, half, INPUT_SIZE).transpose(0, 2, 1).reshape(
        2 * INPUT_SIZE, half)

    w_flat = w.reshape(INPUT_SIZE)       # (4,)
    b_flat = b.reshape(OUTPUT_SIZE)      # (1,)

    flops = (2 * INPUT_SIZE + 2) * B_pad                       # FMAs + bias + relu
    bytes_accessed = (2 * INPUT_SIZE + 2) * half * 4 + (INPUT_SIZE + 1) * 4

    out = pl.pallas_call(
        _linear_relu_kernel,
        out_shape=jax.ShapeDtypeStruct((2, half), jnp.float32),
        grid_spec=pltpu.PrefetchScalarGridSpec(
            num_scalar_prefetch=0,
            grid=(grid_n,),
            in_specs=[
                # 5 scalars live in SMEM: no padded VMEM tiles, no DMAs for them.
                pl.BlockSpec(memory_space=pltpu.MemorySpace.SMEM),
                pl.BlockSpec(memory_space=pltpu.MemorySpace.SMEM),
                # Batch-tiled, sublane-full, lane-dense input block.
                pl.BlockSpec((2 * INPUT_SIZE, tb), lambda i: (0, i)),
            ],
            out_specs=pl.BlockSpec((2, tb), lambda i: (0, i)),
        ),
        compiler_params=pltpu.CompilerParams(
            # parallel batch axis: shards across v7x's 2 TCs, harmless on v5e/v6e.
            dimension_semantics=("parallel",)),
        cost_estimate=pl.CostEstimate(
            flops=flops, transcendentals=0, bytes_accessed=bytes_accessed),
    )(w_flat, b_flat, xp)

    # Row-major (2, half) == [group A rows ; group B rows] == padded batch order:
    # recover (B, 1) with a free reshape (no transpose) and drop batch padding.
    # Padded rows computed relu(b) and are sliced off here.
    return out.reshape(B_pad, OUTPUT_SIZE)[:B]


if __name__ == "__main__":
    key = jax.random.PRNGKey(0)
    kx, kw, kb = jax.random.split(key, 3)

    # Small example batch consistent with the module's forward (B, input_size).
    B = 8
    x = jax.random.normal(kx, (B, INPUT_SIZE), dtype=jnp.float32)

    # Deterministic param init mimicking nn.Linear default: U(-1/sqrt(in), 1/sqrt(in)).
    bound = 1.0 / (INPUT_SIZE ** 0.5)
    w = jax.random.uniform(kw, (INPUT_SIZE, OUTPUT_SIZE), jnp.float32, -bound, bound)
    b = jax.random.uniform(kb, (OUTPUT_SIZE,), jnp.float32, -bound, bound)

    out = neural_network_forward(x, w, b)
    out = jax.block_until_ready(out)

    # Reference check in plain JAX.
    ref = jnp.maximum(x @ w + b[None, :], 0.0)
    assert out.shape == (B, OUTPUT_SIZE)
    assert jnp.allclose(out, ref, atol=1e-5, rtol=1e-5)

    print("KERNEL_OK")
</pallas_src>

<mosaic_0001>
module attributes {stable_mosaic.version = 11 : i64} {
  func.func @_linear_relu_kernel(%arg0: i32, %arg1: memref<4xf32, #tpu.memory_space<smem>>, %arg2: memref<1xf32, #tpu.memory_space<smem>>, %arg3: memref<8x128xf32, #tpu.memory_space<vmem>>, %arg4: memref<2x128xf32, #tpu.memory_space<vmem>>) attributes {dimension_semantics = [#tpu.dimension_semantics<parallel>], iteration_bounds = array<i64: 1>, scalar_prefetch = 0 : i64, scratch_operands = 0 : i64, tpu.core_type = #tpu.core_type<tc>, window_params = [{transform_indices = @transform_0, window_bounds = array<i64: 4>}, {transform_indices = @transform_1, window_bounds = array<i64: 1>}, {transform_indices = @transform_2, window_bounds = array<i64: 8, 128>}, {transform_indices = @transform_3, window_bounds = array<i64: 2, 128>}]} {
    %c0 = arith.constant 0 : index
    %c0_0 = arith.constant 0 : index
    %0 = vector.load %arg3[%c0, %c0_0] : memref<8x128xf32, #tpu.memory_space<vmem>>, vector<8x128xf32>
    %1 = vector.extract_strided_slice %0 {offsets = [0, 0], sizes = [1, 128], strides = [1, 1]} : vector<8x128xf32> to vector<1x128xf32>
    %c0_1 = arith.constant 0 : index
    %2 = memref.load %arg1[%c0_1] : memref<4xf32, #tpu.memory_space<smem>>
    %3 = vector.broadcast %2 : f32 to vector<1x128xf32>
    %4 = arith.mulf %1, %3 : vector<1x128xf32>
    %5 = vector.extract_strided_slice %0 {offsets = [4, 0], sizes = [1, 128], strides = [1, 1]} : vector<8x128xf32> to vector<1x128xf32>
    %c0_2 = arith.constant 0 : index
    %6 = memref.load %arg1[%c0_2] : memref<4xf32, #tpu.memory_space<smem>>
    %7 = vector.broadcast %6 : f32 to vector<1x128xf32>
    %8 = arith.mulf %5, %7 : vector<1x128xf32>
    %9 = vector.extract_strided_slice %0 {offsets = [1, 0], sizes = [1, 128], strides = [1, 1]} : vector<8x128xf32> to vector<1x128xf32>
    %c1 = arith.constant 1 : index
    %10 = memref.load %arg1[%c1] : memref<4xf32, #tpu.memory_space<smem>>
    %11 = vector.broadcast %10 : f32 to vector<1x128xf32>
    %12 = arith.mulf %9, %11 : vector<1x128xf32>
    %13 = arith.addf %4, %12 : vector<1x128xf32>
    %14 = vector.extract_strided_slice %0 {offsets = [5, 0], sizes = [1, 128], strides = [1, 1]} : vector<8x128xf32> to vector<1x128xf32>
    %c1_3 = arith.constant 1 : index
    %15 = memref.load %arg1[%c1_3] : memref<4xf32, #tpu.memory_space<smem>>
    %16 = vector.broadcast %15 : f32 to vector<1x128xf32>
    %17 = arith.mulf %14, %16 : vector<1x128xf32>
    %18 = arith.addf %8, %17 : vector<1x128xf32>
    %19 = vector.extract_strided_slice %0 {offsets = [2, 0], sizes = [1, 128], strides = [1, 1]} : vector<8x128xf32> to vector<1x128xf32>
    %c2 = arith.constant 2 : index
    %20 = memref.load %arg1[%c2] : memref<4xf32, #tpu.memory_space<smem>>
    %21 = vector.broadcast %20 : f32 to vector<1x128xf32>
    %22 = arith.mulf %19, %21 : vector<1x128xf32>
    %23 = arith.addf %13, %22 : vector<1x128xf32>
    %24 = vector.extract_strided_slice %0 {offsets = [6, 0], sizes = [1, 128], strides = [1, 1]} : vector<8x128xf32> to vector<1x128xf32>
    %c2_4 = arith.constant 2 : index
    %25 = memref.load %arg1[%c2_4] : memref<4xf32, #tpu.memory_space<smem>>
    %26 = vector.broadcast %25 : f32 to vector<1x128xf32>
    %27 = arith.mulf %24, %26 : vector<1x128xf32>
    %28 = arith.addf %18, %27 : vector<1x128xf32>
    %29 = vector.extract_strided_slice %0 {offsets = [3, 0], sizes = [1, 128], strides = [1, 1]} : vector<8x128xf32> to vector<1x128xf32>
    %c3 = arith.constant 3 : index
    %30 = memref.load %arg1[%c3] : memref<4xf32, #tpu.memory_space<smem>>
    %31 = vector.broadcast %30 : f32 to vector<1x128xf32>
    %32 = arith.mulf %29, %31 : vector<1x128xf32>
    %33 = arith.addf %23, %32 : vector<1x128xf32>
    %34 = vector.extract_strided_slice %0 {offsets = [7, 0], sizes = [1, 128], strides = [1, 1]} : vector<8x128xf32> to vector<1x128xf32>
    %c3_5 = arith.constant 3 : index
    %35 = memref.load %arg1[%c3_5] : memref<4xf32, #tpu.memory_space<smem>>
    %36 = vector.broadcast %35 : f32 to vector<1x128xf32>
    %37 = arith.mulf %34, %36 : vector<1x128xf32>
    %38 = arith.addf %28, %37 : vector<1x128xf32>
    %c0_6 = arith.constant 0 : index
    %39 = memref.load %arg2[%c0_6] : memref<1xf32, #tpu.memory_space<smem>>
    %40 = vector.broadcast %39 : f32 to vector<1x128xf32>
    %41 = arith.addf %33, %40 : vector<1x128xf32>
    %cst = arith.constant 0.000000e+00 : f32
    %42 = vector.broadcast %cst : f32 to vector<1x128xf32>
    %43 = arith.maximumf %41, %42 : vector<1x128xf32>
    %c0_7 = arith.constant 0 : index
    %c0_8 = arith.constant 0 : index
    %44 = vector.load %arg4[%c0_7, %c0_8] : memref<2x128xf32, #tpu.memory_space<vmem>>, vector<1x128xf32>
    tpu.vector_store %arg4[%c0_7, %c0_8], %43 {strides = array<i32>} : memref<2x128xf32, #tpu.memory_space<vmem>>, vector<1x128xf32>,
    %45 = vector.broadcast %39 : f32 to vector<1x128xf32>
    %46 = arith.addf %38, %45 : vector<1x128xf32>
    %cst_9 = arith.constant 0.000000e+00 : f32
    %47 = vector.broadcast %cst_9 : f32 to vector<1x128xf32>
    %48 = arith.maximumf %46, %47 : vector<1x128xf32>
    %c1_10 = arith.constant 1 : index
    %c0_11 = arith.constant 0 : index
    %49 = vector.load %arg4[%c1_10, %c0_11] : memref<2x128xf32, #tpu.memory_space<vmem>>, vector<1x128xf32>
    tpu.vector_store %arg4[%c1_10, %c0_11], %48 {strides = array<i32>} : memref<2x128xf32, #tpu.memory_space<vmem>>, vector<1x128xf32>,
    return
  }
  func.func @transform_0(%arg0: i32) -> i32 {
    %c0_i32 = arith.constant 0 : i32
    %c0_i32_0 = arith.constant 0 : i32
    return %c0_i32 : i32
  }
  func.func @transform_1(%arg0: i32) -> i32 {
    %c0_i32 = arith.constant 0 : i32
    %c0_i32_0 = arith.constant 0 : i32
    return %c0_i32 : i32
  }
  func.func @transform_2(%arg0: i32) -> (i32, i32) {
    %c0_i32 = arith.constant 0 : i32
    %c0_i32_0 = arith.constant 0 : i32
    return %c0_i32, %arg0 : i32, i32
  }
  func.func @transform_3(%arg0: i32) -> (i32, i32) {
    %c0_i32 = arith.constant 0 : i32
    %c0_i32_0 = arith.constant 0 : i32
    return %c0_i32, %arg0 : i32, i32
  }
}

</mosaic_0001>

<bundles_post_ra>
// kernel: tpu_custom_call.1
= control target key start
LH: loop header
LB: loop body
LE: loop exit
PB: predicated region body
PF: predicated region fallthrough
CT: control target
= control target key end

     0   :  { %9 = vsyncpa [#allocation6], 0  ;;  %s187_s0 = inlined_call_operand.vmem [shape: f32[4], index: 0, kind: input, shape index: {}]   ;;  %s188_s1 = inlined_call_operand.<no memory space> [shape: f32[1], index: 1, kind: input, shape index: {}]   ;;  %s189_s2 = inlined_call_operand.hbm [shape: f32[8,128], index: 2, kind: input, shape index: {}]   ;;  %s190_s3 = inlined_call_operand.hbm [shape: f32[2,128], index: 3, kind: output, shape index: {}]  }
   0x1   :  { %10 = vsyncpa [#allocation4], 0 }
   0x2   :  { %11 = vsyncpa [#allocation5], 0  ;;  %s18_s14 = sshll.u32 %s187_s0, 4  ;;  %s19_s14 = int_to_ptr.vmem [resolvable:$true] %s18_s14 }
   0x3   :  { %s94_s15 = scalar_lea.vmem %s19_s14, 16  ;;  %p99_p1 = scmp.lt.s32.totalorder %s19_s14, %s19_s14 }
   0x4   :  { %p95_p0 = scmp.ne.s32.totalorder %s19_s14, %s94_s15  ;;  %p100_p2 = scmp.lt.s32.totalorder %s94_s15, %s94_s15 }
   0x6   :  { %p101_p3 = por %p100_p2, %p99_p1 }
   0x8   :  { %p102_p4 = pnand %p101_p3, %p95_p0 }
   0xa   :  { %105 = shalt.err (!%p102_p4)
}
   0xb   :  { %s152_s16 = smov [#allocation3]   ;;  %s153_s17 = smov [#allocation7]  }
   0xc   :  { %21 = dma.vmem_to_smem %s19_s14, 16, %s152_s16, [#allocation6]  }
   0xd   :  { %s30_s18 = sshll.u32 %s153_s17, 4  ;;  %s31_s18 = int_to_ptr.vmem [resolvable:$true] %s30_s18 }
   0xe   :  { %s114_s19 = scalar_lea.vmem %s31_s18, 128  ;;  %p119_p6 = scmp.lt.s32.totalorder %s31_s18, %s31_s18 }
   0xf   :  { %p115_p5 = scmp.ne.s32.totalorder %s31_s18, %s114_s19  ;;  %p120_p7 = scmp.lt.s32.totalorder %s114_s19, %s114_s19 }
  0x11   :  { %p121_p8 = por %p120_p7, %p119_p6 }
  0x13   :  { %p122_p9 = pnand %p121_p8, %p115_p5 }
  0x15   :  { %125 = shalt.err (!%p122_p9)
}
  0x16   :  { %33 = dma.hbm_to_vmem [thread:$0]  %s189_s2, 128, %s31_s18, [#allocation4]  }
  0x17   :  { %146 = dma.done.wait [#allocation6], 16  }
  0x18   :  { %147 = vsyncadd [#allocation6], 4294967280 }
  0x19   :  { %148 = dma.done.wait [#allocation4], 128  }
  0x1a   :  { %149 = vsyncadd [#allocation4], 4294967168 }
  0x1b   :  { %40 = sfence }
  0x1c   :  { %s42_s21 = sld [smem:[#allocation3]]  ;;  %v41_v0 = vld [vmem:[#allocation7] sm:$0xff]  ;;  %v67_v14 = vstv %s188_s1  ;;  %s154_s26 = smov [#allocation8]  }
  0x1d   :  { %s88_s22 = sld [smem:[#allocation3 + $0x1]]  ;;  %s78_s27 = sshll.u32 %s154_s26, 4  ;;  %s79_s27 = int_to_ptr.vmem [resolvable:$true] %s78_s27 }
  0x1e   :  { %s89_s23 = sld [smem:[#allocation3 + $0x2]]  ;;  %s126_s28 = scalar_lea.vmem %s79_s27, 32 }
  0x1f   :  { %s90_s24 = sld [smem:[#allocation3 + $0x3]]  ;;  %p127_p10 = scmp.ne.s32.totalorder %s79_s27, %s126_s28 }
  0x20   :  { %p131_p11 = scmp.lt.s32.totalorder %s79_s27, %s79_s27  ;;  %p132_p12 = scmp.lt.s32.totalorder %s126_s28, %s126_s28 }
  0x22   :  { %v43_v1 = vstv %s42_s21  ;;  %p133_p13 = por %p132_p12, %p131_p11 }
  0x23   :  { %v46_v2 = vstv %s88_s22  ;;  %v44_v3 = vmul.f32 %v43_v1, %v41_v0 }
  0x24   :  { %v47_v4 = vmul.f32 %v46_v2, %v41_v0  ;;  %v53_v5 = vstv %s89_s23  ;;  %p134_p0 = pnand %p133_p13, %p127_p10 }
  0x25   :  { %v54_v6 = vmul.f32 %v53_v5, %v41_v0  ;;  %v60_v7 = vstv %s90_s24 }
  0x26   :  { %v49_v8 = vrot.slane %v47_v4, 1  ;;  %v61_v9 = vmul.f32 %v60_v7, %v41_v0 }
  0x27   :  { %v56_v10 = vrot.slane %v54_v6, 2 }
  0x28   :  { %v51_v11 = vadd.f32 %v49_v8, %v44_v3  ;;  %v63_v12 = vrot.slane %v61_v9, 3 }
  0x2a   :  { %v58_v13 = vadd.f32 %v56_v10, %v51_v11 }
  0x2c   :  { %v65_v15 = vadd.f32 %v63_v12, %v58_v13 }
  0x2e   :  { %v68_v16 = vadd.f32 %v67_v14, %v65_v15 }
  0x30   :  { %v69_v17 = vmax.f32 %v68_v16, 0.0 }
  0x32   :  { %70 = vst [vmem:[#allocation8] sm:$0x1] %v69_v17  ;;  %71 = vst [vmem:[#allocation8 - $0x3] sm:$0x10] %v69_v17 }
  0x33   :  { %137 = shalt.err (!%p134_p0)
}
  0x34   :  { %81 = dma.vmem_to_hbm [thread:$0]  %s79_s27, 32, %s190_s3, [#allocation5]  }
  0x35   :  { %150 = dma.done.wait [#allocation5], 32  }
  0x36   :  { %151 = vsyncadd [#allocation5], 4294967264 }
  0x37   :  { %85 = vsyncpa [#allocation4], 1 }
  0x38   :  { %86 = vsyncpa [#allocation5], 1 }
  0x39   :  { %87 = vsyncpa [#allocation6], 1 }

</bundles_post_ra>
